<compile_context>
chip_gen: v7x
topology: tpu7x:2x2x1
jax: 0.10.0
libtpu: 0.0.40
codegen_flags: <defaults>
</compile_context>

<pallas_src>
import jax
import jax.numpy as jnp
from jax import lax
from jax.experimental import pallas as pl
from jax.experimental.pallas import tpu as pltpu


def _round_up(x, m):
    return ((x + m - 1) // m) * m


def _lora_kernel(x_ref, wa_ref, wb_ref, o_ref):
    # a = x @ Wa^T : (tm, in_f) . (rank, in_f) contracted on last dims -> (tm, rank)
    a = lax.dot_general(
        x_ref[...],
        wa_ref[...],
        dimension_numbers=(((1,), (1,)), ((), ())),
        preferred_element_type=jnp.float32,
    )
    # b = a @ Wb : (tm, rank) @ (rank, out_lanes) -> (tm, out_lanes)
    # Keep `a` in f32 (tiny) and cast only at the store.
    o_ref[...] = jnp.dot(
        a, wb_ref[...].astype(jnp.float32), preferred_element_type=jnp.float32
    ).astype(o_ref.dtype)


def little_lora_forward(x, wa, wb, *, tm=None):
    """LoRA forward: (x @ wa.T) @ wb.

    x : [..., in_features]
    wa: [rank, in_features]   (== A.weight, lane-dense over in_features)
    wb: [rank, out_features]  (== B.weight.T, lane-dense over out_features)
    """
    orig_shape = x.shape
    in_features = orig_shape[-1]
    rank = wa.shape[0]
    out_features = wb.shape[1]

    x2d = x.reshape(-1, in_features)
    M = x2d.shape[0]

    dtype = x.dtype
    db = jnp.dtype(dtype).itemsize
    sub = 16 if db == 2 else 8  # sublane packing (bf16 vs f32)

    # Lane-dense output only for genuinely narrow outputs; wide outputs keep
    # their native width (block == full last dim is always legal) so we avoid an
    # extra full HBM pass from the post-kernel slice.
    if out_features % 128 != 0 and out_features < 256:
        out_lanes = _round_up(out_features, 128)
        wb = jnp.pad(wb, ((0, 0), (0, out_lanes - out_features)))  # rank rows: tiny
        slice_out = True
    else:
        out_lanes = out_features
        slice_out = False

    # Per-generation VMEM budgets: v7x has 64 MiB per TensorCore, v5e/v6e 128 MiB.
    try:
        info = pltpu.get_tpu_info()
        vmem_cap = int(getattr(info, "vmem_capacity_bytes", 64 * 1024 * 1024))
    except Exception:
        vmem_cap = 64 * 1024 * 1024  # conservative fallback
    if vmem_cap <= 64 * 1024 * 1024:          # v7x-class
        budget, vmem_limit = 36 * 1024 * 1024, 48 * 1024 * 1024
    else:                                      # v5e / v6e (128 MiB physical)
        budget, vmem_limit = 48 * 1024 * 1024, 80 * 1024 * 1024

    w_bytes = jnp.dtype(wa.dtype).itemsize
    if tm is None:
        # Grid-invariant weights are still double-buffered by the pipeline.
        rank_sub = _round_up(rank, sub)
        weight_vmem = 2 * rank_sub * (in_features + out_lanes) * w_bytes
        # Per-row streamed footprint: double-buffered x tile + out tile, plus the
        # f32 second-matmul result before the store cast, plus f32 `a`.
        per_row = (2 * in_features * db + 2 * out_lanes * db
                   + 4 * out_lanes + 4 * rank)
        avail = max(per_row * sub, budget - weight_vmem)
        cap = max(sub, min(1024, (avail // per_row) // sub * sub))
        g = max(2, pl.cdiv(M, cap))   # >=2 steps: pipelining / v7x 2-TC split
        g = g + (g % 2)               # even tile count balances v7x TensorCores
        tm = max(sub, _round_up(pl.cdiv(M, g), sub))

    grid_m = pl.cdiv(M, tm)           # ragged last block clipped by Pallas

    # Advisory cost estimate so XLA can schedule/overlap the custom call.
    flops = 2 * M * rank * (in_features + out_lanes)
    bytes_accessed = (db * M * (in_features + out_lanes)
                      + (wa.size + wb.size) * w_bytes)

    out = pl.pallas_call(
        _lora_kernel,
        out_shape=jax.ShapeDtypeStruct((M, out_lanes), dtype),
        grid_spec=pltpu.PrefetchScalarGridSpec(
            num_scalar_prefetch=0,
            grid=(grid_m,),
            in_specs=[
                pl.BlockSpec((tm, in_features), lambda i: (i, 0)),
                # weights are grid-invariant (constant index_map -> no re-DMA)
                pl.BlockSpec((rank, in_features), lambda i: (0, 0)),
                pl.BlockSpec((rank, out_lanes), lambda i: (0, 0)),
            ],
            out_specs=pl.BlockSpec((tm, out_lanes), lambda i: (i, 0)),
        ),
        compiler_params=pltpu.CompilerParams(
            dimension_semantics=("parallel",),
            vmem_limit_bytes=vmem_limit,
        ),
        cost_estimate=pl.CostEstimate(
            flops=flops, transcendentals=0, bytes_accessed=bytes_accessed
        ),
    )(x2d, wa, wb)

    if slice_out:
        out = out[:, :out_features]   # narrow outputs only; cheap
    return out.reshape(*orig_shape[:-1], out_features)


def init_little_lora_params(key, in_features, out_features, rank=8,
                            dtype=jnp.float32):
    """Matches the PyTorch module init:
    A.weight ~ N(0, 0.02) stored as [rank, in_features];
    B.weight = 0, stored pre-transposed as [rank, out_features]."""
    wa = (0.02 * jax.random.normal(key, (rank, in_features))).astype(dtype)
    wb = jnp.zeros((rank, out_features), dtype=dtype)
    return wa, wb


if __name__ == "__main__":
    key = jax.random.PRNGKey(0)
    k_x, k_w, k_b = jax.random.split(key, 3)

    batch, seq, in_features, out_features, rank = 2, 8, 32, 32, 8
    x = jax.random.normal(k_x, (batch, seq, in_features), dtype=jnp.float32)
    wa, wb = init_little_lora_params(k_w, in_features, out_features, rank)

    out = jax.block_until_ready(little_lora_forward(x, wa, wb))
    ref = (x.reshape(-1, in_features) @ wa.T @ wb).reshape(batch, seq, out_features)
    assert out.shape == (batch, seq, out_features)
    assert jnp.allclose(out, ref, atol=1e-5), "mismatch vs reference (zero B)"

    # Non-trivial path with a non-zero B.
    wb2 = (0.02 * jax.random.normal(k_b, (rank, out_features))).astype(jnp.float32)
    out2 = jax.block_until_ready(little_lora_forward(x, wa, wb2))
    ref2 = (x.reshape(-1, in_features) @ wa.T @ wb2).reshape(
        batch, seq, out_features
    )
    assert jnp.allclose(out2, ref2, atol=1e-4), "mismatch vs reference (random B)"

    # Ragged M (not a multiple of the row tile): exercises last-block clipping
    # without any wrapper-side padding or post-kernel row slice.
    x3 = jax.random.normal(jax.random.PRNGKey(2), (3, 5, in_features),
                           dtype=jnp.float32)
    out3 = jax.block_until_ready(little_lora_forward(x3, wa, wb2))
    ref3 = (x3.reshape(-1, in_features) @ wa.T @ wb2).reshape(3, 5, out_features)
    assert jnp.allclose(out3, ref3, atol=1e-4), "mismatch vs reference (ragged M)"

    print("KERNEL_OK")
</pallas_src>

<mosaic_0001>
module attributes {stable_mosaic.version = 11 : i64} {
  func.func @_lora_kernel(%arg0: i32, %arg1: memref<8x32xf32, #tpu.memory_space<vmem>>, %arg2: memref<8x32xf32, #tpu.memory_space<vmem>>, %arg3: memref<8x128xf32, #tpu.memory_space<vmem>>, %arg4: memref<8x128xf32, #tpu.memory_space<vmem>>) attributes {dimension_semantics = [#tpu.dimension_semantics<parallel>], iteration_bounds = array<i64: 2>, scalar_prefetch = 0 : i64, scratch_operands = 0 : i64, tpu.core_type = #tpu.core_type<tc>, window_params = [{transform_indices = @transform_0, window_bounds = array<i64: 8, 32>}, {pipeline_mode = #tpu.pipeline_mode<synchronous>, transform_indices = @transform_1, window_bounds = array<i64: 8, 32>}, {pipeline_mode = #tpu.pipeline_mode<synchronous>, transform_indices = @transform_2, window_bounds = array<i64: 8, 128>}, {transform_indices = @transform_3, window_bounds = array<i64: 8, 128>}]} {
    %c0 = arith.constant 0 : index
    %c0_0 = arith.constant 0 : index
    %0 = vector.load %arg1[%c0, %c0_0] : memref<8x32xf32, #tpu.memory_space<vmem>>, vector<8x32xf32>
    %c0_1 = arith.constant 0 : index
    %c0_2 = arith.constant 0 : index
    %1 = vector.load %arg2[%c0_1, %c0_2] : memref<8x32xf32, #tpu.memory_space<vmem>>, vector<8x32xf32>
    %cst = arith.constant dense<0.000000e+00> : vector<8x8xf32>
    %2 = tpu.matmul %0, %1, %cst {dimension_numbers = #tpu.dot_dimension_numbers<[1], [1], [0], [0], [0, 0, 1, 0], [], []>} : vector<8x32xf32>, vector<8x32xf32>, vector<8x8xf32> -> vector<8x8xf32>
    %c0_3 = arith.constant 0 : index
    %c0_4 = arith.constant 0 : index
    %3 = vector.load %arg3[%c0_3, %c0_4] : memref<8x128xf32, #tpu.memory_space<vmem>>, vector<8x128xf32>
    %cst_5 = arith.constant dense<0.000000e+00> : vector<8x128xf32>
    %4 = tpu.matmul %2, %3, %cst_5 {dimension_numbers = #tpu.dot_dimension_numbers<[1], [0], [0], [1], [0, 0, 1, 1], [], []>} : vector<8x8xf32>, vector<8x128xf32>, vector<8x128xf32> -> vector<8x128xf32>
    %c0_6 = arith.constant 0 : index
    %c0_7 = arith.constant 0 : index
    %5 = vector.load %arg4[%c0_6, %c0_7] : memref<8x128xf32, #tpu.memory_space<vmem>>, vector<8x128xf32>
    tpu.vector_store %arg4[%c0_6, %c0_7], %4 {strides = array<i32>} : memref<8x128xf32, #tpu.memory_space<vmem>>, vector<8x128xf32>,
    return
  }
  func.func @transform_0(%arg0: i32) -> (i32, i32) {
    %c0_i32 = arith.constant 0 : i32
    %c0_i32_0 = arith.constant 0 : i32
    return %arg0, %c0_i32 : i32, i32
  }
  func.func @transform_1(%arg0: i32) -> (i32, i32) {
    %c0_i32 = arith.constant 0 : i32
    %c0_i32_0 = arith.constant 0 : i32
    %c0_i32_1 = arith.constant 0 : i32
    return %c0_i32, %c0_i32_0 : i32, i32
  }
  func.func @transform_2(%arg0: i32) -> (i32, i32) {
    %c0_i32 = arith.constant 0 : i32
    %c0_i32_0 = arith.constant 0 : i32
    %c0_i32_1 = arith.constant 0 : i32
    return %c0_i32, %c0_i32_0 : i32, i32
  }
  func.func @transform_3(%arg0: i32) -> (i32, i32) {
    %c0_i32 = arith.constant 0 : i32
    %c0_i32_0 = arith.constant 0 : i32
    return %arg0, %c0_i32 : i32, i32
  }
}

</mosaic_0001>

<bundles_post_ra>
// kernel: tpu_custom_call.1
= control target key start
LH: loop header
LB: loop body
LE: loop exit
PB: predicated region body
PF: predicated region fallthrough
CT: control target
= control target key end

     0   :  { %8 = vsyncpa [#allocation3], 0  ;;  %s980_s0 = inlined_call_operand.hbm [shape: f32[16,32], index: 0, kind: input, shape index: {}]   ;;  %s981_s1 = inlined_call_operand.hbm [shape: f32[8,32], index: 1, kind: input, shape index: {}]   ;;  %s982_s2 = inlined_call_operand.hbm [shape: f32[8,128], index: 2, kind: input, shape index: {}]   ;;  %s983_s3 = inlined_call_operand.hbm [shape: f32[16,128], index: 3, kind: output, shape index: {}]  }
   0x1   :  { %10 = vsyncpa [#allocation3 + $0x1], 0 }
   0x2   :  { %11 = vsyncpa [#allocation6], 0 }
   0x3   :  { %12 = vsyncpa [#allocation4], 0 }
   0x4   :  { %14 = vsyncpa [#allocation4 + $0x1], 0  ;;  %s755_s12 = smov 0   ;;  %s757_s13 = smov 0  }
   0x5   :  { %s759_s14 = smov 0   ;;  %s761_s15 = smov 0  }
   0x6 LB: > { %s776_s16 = sadd.s32 4294967295, %s727_s15   ;;  %s469_s17 = sadd.s32 4294967294, %s727_s15   ;;  %s727_s15 = sphi %s761_s15, %s1003_s15   ;;  %s723_s14 = sphi %s759_s14, %s1002_s14   ;;  %s719_s13 = sphi %s757_s13, %s1001_s13   ;;  %s715_s12 = sphi %s755_s12, %s1000_s12  }
   0x7   : > { %p40_p0 = scmp.ne.s32.totalorder %s719_s13, %s715_s12  ;;  %p984_p1 = scmp.eq.s32.totalorder %s776_s16, 0 }
   0x8   : > { %p112_p3 = scmp.eq.s32.totalorder %s469_s17, 1  ;;  %p470_p5 = scmp.ge.s32.totalorder %s727_s15, 1 }
   0x9   : > { %p785_p4 = por %p984_p1, %p40_p0  ;;  %p119_p7 = scmp.lt.s32.totalorder %s727_s15, 3 }
   0xa   : > { %p790_p6 = por %p112_p3, %p40_p0  ;;  %s729_s21 = smov [#allocation5]  }
   0xb   : > { %s987_s18 = scalar_select %p785_p4, 1, 0 }
   0xc   : > { %s988_s19 = scalar_select %p790_p6, 1, 0 }
   0xd   : > { %p795_p8 = pnand %p470_p5, %p119_p7  ;;  %s132_s22 = sshll.u32 %s729_s21, 4  ;;  %s133_s22 = int_to_ptr.vmem [resolvable:$true] %s132_s22 }
   0xe   : > { %s730_s23 = smov [#allocation7]   ;;  %s811_s26 = sadd.s32 1, %s727_s15  }
   0xf   : > { %s989_s20 = scalar_select %p795_p8, 1, 0 }
  0x10   : > { %p514_p10 = pneg %p795_p8  ;;  %s143_s24 = sshll.u32 %s730_s23, 4  ;;  %s808_s24 = int_to_ptr.vmem [resolvable:$true] %s143_s24 }
  0x11   : > { %s24_s27 = ssub.s32 %s727_s15, %s811_s26  ;;  %s571_s30 = scalar_lea.hbm %s981_s1, 128 }
  0x12   : > { %p804_p11 = pnand %p514_p10, %p984_p1  ;;  %p572_p12 = scmp.ne.s32.totalorder %s981_s1, %s571_s30 }
  0x13   : > { %p578_p5 = scmp.lt.u32.totalorder %s571_s30, %s981_s1 }
  0x14   : > { %p573_p13 = pneg %p804_p11 }
  0x16   : > { %p574_p0 = pnand %p573_p13, %p572_p12 }
  0x18   : > { %p575_p3 = pneg %p574_p0 }
  0x1a   : > { %p580_p7 = pnand %p578_p5, %p575_p3 }
  0x1c   : > { %583 = shalt.err (!%p580_p7)
}
  0x1d   : > { %s584_s8 = scalar_lea.vmem %s133_s22, 128  ;;  %p592_p2 = scmp.lt.s32.totalorder %s133_s22, %s133_s22 }
  0x1e   : > { %p585_p10 = scmp.ne.s32.totalorder %s133_s22, %s584_s8  ;;  %p593_p6 = scmp.lt.s32.totalorder %s584_s8, %s584_s8 }
  0x20   : > { %p587_p9 = pnand %p585_p10, %p573_p13  ;;  %p594_p4 = por %p593_p6, %p592_p2 }
  0x22   : > { %p588_p1 = pneg %p587_p9 }
  0x24   : > { %p595_p8 = pnand %p594_p4, %p588_p1 }
  0x26   : > { %598 = shalt.err (!%p595_p8)
}
  0x27   : > { %517 = dma.hbm_to_vmem [thread:$0]  (!%p804_p11), %s981_s1, 128, %s133_s22, [#allocation6]  }
  0x28   : > { %s599_s21 = scalar_lea.hbm %s982_s2, 128 }
  0x29   : > { %p600_p9 = scmp.ne.s32.totalorder %s982_s2, %s599_s21  ;;  %p606_p4 = scmp.lt.u32.totalorder %s599_s21, %s982_s2 }
  0x2b   : > { %p602_p2 = pnand %p600_p9, %p573_p13 }
  0x2d   : > { %p603_p1 = pneg %p602_p2 }
  0x2f   : > { %p608_p6 = pnand %p606_p4, %p603_p1 }
  0x31   : > { %611 = shalt.err (!%p608_p6)
}
  0x32   : > { %s612_s22 = scalar_lea.vmem %s808_s24, 128  ;;  %p620_p3 = scmp.lt.s32.totalorder %s808_s24, %s808_s24 }
  0x33   : > { %p613_p8 = scmp.ne.s32.totalorder %s808_s24, %s612_s22  ;;  %p621_p5 = scmp.lt.s32.totalorder %s612_s22, %s612_s22 }
  0x35   : > { %p615_p12 = pnand %p613_p8, %p573_p13  ;;  %p622_p7 = por %p621_p5, %p620_p3 }
  0x37   : > { %p616_p0 = pneg %p615_p12 }
  0x39   : > { %p623_p10 = pnand %p622_p7, %p616_p0 }
  0x3b   : > { %626 = shalt.err (!%p623_p10)
}
  0x3c   : > { %520 = dma.hbm_to_vmem [thread:$0]  (!%p804_p11), %s982_s2, 128, %s808_s24, [#allocation6]  }
  0x3d   : > { %p25_p13 = scmp.eq.s32.totalorder %s24_s27, 0  ;;  %s27_s6 = sadd.s32 1, %s723_s14 }
  0x3e   : > { %p34_p9 = scmp.ne.s32.totalorder %s723_s14, %s719_s13  ;;  %p35_p2 = scmp.eq.s32.totalorder %s727_s15, 0 }
  0x3f   : > { %s870_s25 = scalar_select %p25_p13, %s723_s14, %s27_s6  }
  0x40   : > { %p36_p1 = por %p35_p2, %p34_p9  ;;  %p991_p4 = scmp.eq.s32.totalorder %s776_s16, 1 }
  0x41   : > { %p531_p8 = scmp.lt.s32.totalorder %s727_s15, 2  ;;  %s154_s8 = sand.u32 1, %s723_s14  }
  0x42   : > { %p874_p6 = por %p991_p4, %p34_p9  ;;  %s474_s9 = sshll.u32 %s154_s8, 3 }
  0x43   : > { %s475_s10 = sshll.u32 %s727_s15, 7  ;;  %s158_s27 = scalar_lea.vmem [#allocation2], %s474_s9 }
  0x44   : > { %s884_s24 = scalar_lea.hbm %s980_s0, %s475_s10  ;;  %s165_s21 = sshll.u32 %s158_s27, 4  ;;  %s886_s21 = int_to_ptr.vmem [resolvable:$true] %s165_s21 }
  0x45   : > { %p888_p11 = pnand %p531_p8, %p36_p1  ;;  %s155_s28 = scalar_lea.sflag [#allocation3], %s154_s8 }
  0x46   : > { %s627_s29 = scalar_lea.hbm %s884_s24, 128  ;;  %s632_s4 = scalar_lea.hbm %s980_s0, 256 }
  0x47   : > { %p628_p12 = scmp.ne.s32.totalorder %s884_s24, %s627_s29  ;;  %p629_p0 = pneg %p888_p11 }
  0x48   : > { %p633_p7 = scmp.lt.u32.totalorder %s884_s24, %s980_s0  ;;  %p634_p10 = scmp.lt.u32.totalorder %s632_s4, %s627_s29 }
  0x49   : > { %p630_p3 = pnand %p629_p0, %p628_p12  ;;  %p636_p9 = scmp.lt.u32.totalorder %s627_s29, %s884_s24 }
  0x4a   : > { %p635_p13 = por %p634_p10, %p633_p7 }
  0x4b   : > { %p631_p5 = pneg %p630_p3 }
  0x4c   : > { %p637_p2 = por %p636_p9, %p635_p13 }
  0x4e   : > { %p638_p1 = pnand %p637_p2, %p631_p5 }
  0x50   : > { %641 = shalt.err (!%p638_p1)
}
  0x51   : > { %s642_s8 = scalar_lea.vmem %s886_s21, 128  ;;  %s731_s9 = smov [#allocation2]  }
  0x52   : > { %p643_p4 = scmp.ne.s32.totalorder %s886_s21, %s642_s8  ;;  %s647_s10 = sshll.u32 %s731_s9, 4  ;;  %s648_s10 = int_to_ptr.vmem [resolvable:$false] %s647_s10 }
  0x53   : > { %s649_s11 = scalar_lea.vmem %s648_s10, 256  ;;  %p650_p3 = scmp.lt.s32.totalorder %s886_s21, %s648_s10 }
  0x54   : > { %p645_p8 = pnand %p643_p4, %p629_p0  ;;  %p651_p7 = scmp.lt.s32.totalorder %s649_s11, %s642_s8 }
  0x56   : > { %p646_p12 = pneg %p645_p8  ;;  %p652_p10 = por %p651_p7, %p650_p3 }
  0x58   : > { %p653_p13 = pnand %p652_p10, %p646_p12 }
  0x5a   : > { %656 = shalt.err (!%p653_p13)
}
  0x5b   : > { %524 = dma.hbm_to_vmem [thread:$0]  (!%p888_p11), %s884_s24, 128, %s886_s21, %s155_s28  }
  0x5c   : > { %p994_p5 = scmp.ne.s32.totalorder %s989_s20, 0 }
  0x5d   : > { %s920_s17 = sand.u32 (!%p994_p5), 1, %s719_s13   ;;  %p995_p0 = scmp.ne.s32.totalorder (!%p994_p5), %s987_s18, 0 }
  0x5e   : > { %174 = sbr.rel (%p994_p5) target bundleno = 549 (0x225), region = 32  ;;  %s477_s27 = sshll.u32 (!%p994_p5), %s920_s17, 3 }
  0x5f   : > { %s177_s29 = scalar_lea.sflag (!%p994_p5), [#allocation3], %s920_s17  ;;  %s180_s30 = scalar_lea.vmem (!%p994_p5), [#allocation2], %s477_s27 }
  0x65   : > { %702 = dma.done.wait (%p995_p0), %s177_s29, 128  }
  0x66   : > { %704 = vsyncadd (%p995_p0), %s177_s29, 4294967168  ;;  %p996_p9 = scmp.eq.s32.totalorder %s776_s16, 0 }
  0x68   : > { %706 = dma.done.wait (%p996_p9), [#allocation6], 256   ;;  %p997_p11 = pmov %p996_p9 }
  0x69   : > { %v732_v0 = vmov 0.0   ;;  %vm733_vm0 = vmmov 0   ;;  %vm213_vm1 = vcmask 261120   ;;  %v212_v1 = vld [vmem:[#allocation5] sm:$0xff]  ;;  %v211_v2 = vld [vmem:[%s180_s30] sm:$0xff]  ;;  %v290_v3 = vld [vmem:[#allocation7] sm:$0xff] }
  0x6a   : > { %708 = vsyncadd (%p997_p11), [#allocation6], 4294967040  ;;  %492 = vmatprep.subr.mxu0 %v732_v0  ;;  %494 = vmatprep.mubr.msk.f32.mxu0 %vm733_vm0, %v732_v0  ;;  %vm291_vm2 = vcmask 64512   ;;  %s210_s18 = scalar_lea.vmem [#allocation8], %s477_s27  ;;  %s485_s24 = sshll.u32 %s776_s16, 7 }
  0x6b   : > { %497 = vmatprep.subr.mxu1 %v732_v0  ;;  %499 = vmatprep.mubr.msk.f32.mxu1 %vm733_vm0, %v732_v0  ;;  %s380_s20 = sshll.u32 %s210_s18, 4  ;;  %s938_s28 = scalar_lea.hbm %s983_s3, %s485_s24  ;;  %s933_s20 = int_to_ptr.vmem [resolvable:$true] %s380_s20 }
  0x6c   : > { %493 = vmatpush3.xpose.msk.msra.mxu0 %vm213_vm1, %v212_v1  ;;  %498 = vmatpush3.msra.mxu1 %v290_v3  ;;  %s367_s22 = scalar_lea.sflag [#allocation4], %s920_s17  ;;  %s657_s4 = scalar_lea.vmem %s933_s20, 128 }
  0x6d   : > { %p658_p2 = scmp.ne.s32.totalorder %s933_s20, %s657_s4  ;;  %s734_s16 = smov [#allocation8]  }
  0x6e   : > { %s661_s5 = sshll.u32 %s734_s16, 4  ;;  %s662_s5 = int_to_ptr.vmem [resolvable:$false] %s661_s5 }
  0x6f   : > { %495 = vmatmul.mubr.msk.f32.vlgmr.msra.gmra.mrb[0].mxu0 %vm213_vm1, %v211_v2  ;;  %p659_p1 = pnand %p658_p2, %p874_p6  ;;  %s663_s6 = scalar_lea.vmem %s662_s5, 256 }
  0x70   : > { %p664_p8 = scmp.lt.s32.totalorder %s933_s20, %s662_s5  ;;  %p665_p12 = scmp.lt.s32.totalorder %s663_s6, %s657_s4 }
  0x71   : > { %p660_p4 = pneg %p659_p1 }
  0x72   : > { %p666_p3 = por %p665_p12, %p664_p8 }
  0x74   : > { %p667_p7 = pnand %p666_p3, %p660_p4 }
 0x142   : > { %v286_v4 = vpop.f32.mrb[0].mxu0 }
 0x143   : > { %v496_v5 = vpop.f32.mrb[1].mxu0  ;;  %500 = vmatmul.mubr.msk.f32.vlgmr.msra.gmra.mrb[0].mxu1 %vm291_vm2, %v286_v4 }
 0x216   : > { %v361_v6 = vpop.f32.mrb[0].mxu1 }
 0x217   : > { %365 = vst [vmem:[%s210_s18] sm:$0xff] %v361_v6  ;;  %v501_v7 = vpop.f32.mrb[1].mxu1 }
 0x218   : > { %670 = shalt.err (!%p667_p7)
}
 0x219   : > { %s671_s8 = scalar_lea.hbm %s938_s28, 128  ;;  %s675_s11 = scalar_lea.hbm %s983_s3, 256 }
 0x21a   : > { %p672_p10 = scmp.ne.s32.totalorder %s938_s28, %s671_s8  ;;  %p676_p0 = scmp.lt.u32.totalorder %s938_s28, %s983_s3 }
 0x21b   : > { %p677_p9 = scmp.lt.u32.totalorder %s675_s11, %s671_s8  ;;  %p679_p2 = scmp.lt.u32.totalorder %s671_s8, %s938_s28 }
 0x21c   : > { %p673_p13 = pnand %p672_p10, %p874_p6 }
 0x21d   : > { %p678_p11 = por %p677_p9, %p676_p0 }
 0x21e   : > { %p674_p5 = pneg %p673_p13 }
 0x21f   : > { %p680_p1 = por %p679_p2, %p678_p11 }
 0x221   : > { %p681_p4 = pnand %p680_p1, %p674_p5 }
 0x223   : > { %684 = shalt.err (!%p681_p4)
}
 0x224   : > { %512 = dma.vmem_to_hbm [thread:$0]  (%p874_p6), %s933_s20, 128, %s938_s28, %s367_s22  }
 0x225 PF: > { %s392_s29 = sand.u32 1, %s715_s12   ;;  %p998_p8 = scmp.ne.s32.totalorder %s988_s19, 0 }
 0x226   : > { %p999_p12 = scmp.ge.s32.totalorder %s727_s15, 2  ;;  %s393_s30 = scalar_lea.sflag [#allocation4], %s392_s29 }
 0x228   : > { %p526_p3 = pnand %p999_p12, %p998_p8 }
 0x22a   : > { %710 = dma.done.wait (!%p526_p3), %s393_s30, 128  }
 0x22b   : > { %712 = vsyncadd (!%p526_p3), %s393_s30, 4294967168  ;;  %p17_p7 = scmp.ge.s32.totalorder %s811_s26, 4   ;;  %s1000_s12 = smov %s719_s13 }
 0x22c   : > { %s1001_s13 = smov %s723_s14  ;;  %s1002_s14 = smov %s870_s25 }
 0x22d   : > { %s1003_s15 = smov %s811_s26  ;;  %19 = sbr.rel (!%p17_p7) target bundleno = 6 (0x6), region = 85 }
 0x234   :  { %398 = vsyncpa [#allocation3], 1 }
 0x235   :  { %400 = vsyncpa [#allocation3 + $0x1], 1 }
 0x236   :  { %401 = vsyncpa [#allocation6], 1 }
 0x237   :  { %402 = vsyncpa [#allocation4], 1 }
 0x238   :  { %404 = vsyncpa [#allocation4 + $0x1], 1 }

</bundles_post_ra>
